<compile_context>
chip_gen: v7x
topology: tpu7x:2x2x1
jax: 0.10.0
libtpu: 0.0.40
codegen_flags: <defaults>
</compile_context>

<pallas_src>
import functools

import jax
import jax.numpy as jnp
from jax.experimental import pallas as pl
from jax.experimental.pallas import tpu as pltpu

# Reproduces masked_fill_(-inf): masked probabilities are exactly 0 (exp
# underflows), but cannot produce NaN (the diagonal is never masked).
_MASK_VALUE = -1e30


def _attn_kernel(x_ref, wqkv_ref, out_ref, attn_ref, *, B, L, n):
    BL = B * L

    x = x_ref[...]                # (2*B*L, n)  == [dec_flat ; enc_flat]
    wqkv = wqkv_ref[...]          # (n, 3*n)    == [W_Q | W_K | W_V]

    # One MXU pass for all three projections.
    qkv = jnp.dot(x, wqkv, preferred_element_type=jnp.float32)   # (2*B*L, 3n)
    q = qkv[:BL, :n]              # decoder rows, W_Q columns
    k = qkv[BL:, n:2 * n]         # encoder rows, W_K columns
    v = qkv[BL:, 2 * n:]          # encoder rows, W_V columns

    # Batch-folded scores: one 2-D contraction over the feature dim
    # (no materialized K^T).
    s = jnp.einsum("qd,kd->qk", q, k,
                   preferred_element_type=jnp.float32)            # (BL, BL)

    # Combined mask over the folded batch: different-batch block OR causal
    # (key position > query position within the batch).
    qi = jax.lax.broadcasted_iota(jnp.int32, (BL, BL), 0)
    kj = jax.lax.broadcasted_iota(jnp.int32, (BL, BL), 1)
    if L & (L - 1) == 0:
        # Power-of-two L: shifts/ands only (cheapest, always-supported VPU ops).
        shift = L.bit_length() - 1
        q_batch, k_batch = qi >> shift, kj >> shift
        q_pos, k_pos = qi & (L - 1), kj & (L - 1)
    else:
        q_batch, k_batch = qi // L, kj // L
        q_pos, k_pos = qi % L, kj % L
    mask = (q_batch != k_batch) | (k_pos > q_pos)
    s = jnp.where(mask, _MASK_VALUE, s)

    # Numerically stable softmax over all BL keys.  Cross-batch / future keys
    # exp-underflow to exactly 0, so rows match per-batch softmax over L keys.
    # (The module's second `attn / attn.sum(-1)` is a mathematical no-op.)
    m = jnp.max(s, axis=-1, keepdims=True)
    p = jnp.exp(s - m)
    denom = jnp.sum(p, axis=-1, keepdims=True)
    attn = p * pl.reciprocal(denom, approx=False)                 # (BL, BL)

    # Output: cross-batch weights are exactly 0, so one 2-D matmul over the
    # stacked V gives the correct per-batch result.
    out = jnp.dot(attn, v, preferred_element_type=jnp.float32)    # (BL, n)
    out_ref[...] = out.astype(out_ref.dtype)

    # Attention map: extract the B diagonal LxL blocks (static slices).
    attn_ref[...] = jnp.concatenate(
        [attn[b * L:(b + 1) * L, b * L:(b + 1) * L] for b in range(B)],
        axis=0).astype(attn_ref.dtype)


def fuse_qkv_weights(W_Q, W_K, W_V):
    """Fuse the projection weights into one RHS.  Call ONCE at parameter
    setup time (hoisted out of the per-forward-call path)."""
    return jnp.concatenate([W_Q, W_K, W_V], axis=1)               # (n, 3n)


@jax.jit
def encoder_decoder_attention(decoder_input, encoder_output, W_QKV):
    B, L, n = decoder_input.shape
    Be, Le, ne = encoder_output.shape
    assert B == Be and n == ne
    assert L == Le, "the triu mask in the reference requires L_dec == L_enc"
    assert W_QKV.shape == (n, 3 * n)

    BL = B * L
    # Stack decoder / encoder rows so one matmul computes Q, K and V.
    x = jnp.concatenate([decoder_input.reshape(BL, n),
                         encoder_output.reshape(BL, n)], axis=0)   # (2*BL, n)

    kernel = functools.partial(_attn_kernel, B=B, L=L, n=n)

    flops = 2 * (2 * BL) * n * (3 * n) + 2 * (2 * BL * BL * n)
    bytes_accessed = 4 * (2 * BL * n + n * 3 * n + BL * n + BL * L)
    transcendentals = BL * BL

    vmem_spec = pl.BlockSpec(memory_space=pltpu.MemorySpace.VMEM)

    out_flat, attn_flat = pl.pallas_call(
        kernel,
        out_shape=(jax.ShapeDtypeStruct((BL, n), jnp.float32),
                   jax.ShapeDtypeStruct((BL, L), jnp.float32)),
        in_specs=[vmem_spec, vmem_spec],
        out_specs=(vmem_spec, vmem_spec),
        cost_estimate=pl.CostEstimate(flops=flops,
                                      transcendentals=transcendentals,
                                      bytes_accessed=bytes_accessed),
    )(x, W_QKV)

    # Leading-dim reshapes only (layout no-ops).
    return out_flat.reshape(B, L, n), attn_flat.reshape(B, L, L)


def _reference(decoder_input, encoder_output, W_Q, W_K, W_V):
    # Faithful JAX port of the PyTorch module (incl. redundant renorm, -inf mask).
    Q = decoder_input @ W_Q
    K = encoder_output @ W_K
    V = encoder_output @ W_V
    S = jnp.einsum("bld,bmd->blm", Q, K)
    L = S.shape[-1]
    mask = jnp.triu(jnp.ones((L, L), dtype=bool), k=1)
    S = jnp.where(mask, -jnp.inf, S)
    attn = jax.nn.softmax(S, axis=-1)
    attn = attn / jnp.sum(attn, axis=-1, keepdims=True)
    out = jnp.einsum("blm,bmd->bld", attn, V)
    return out, attn


if __name__ == "__main__":
    B, L, n = 2, 8, 32

    key = jax.random.PRNGKey(0)
    k_dec, k_enc, k_wq, k_wk, k_wv = jax.random.split(key, 5)

    decoder_input = jax.random.normal(k_dec, (B, L, n), dtype=jnp.float32)
    encoder_output = jax.random.normal(k_enc, (B, L, n), dtype=jnp.float32)
    W_Q = jax.random.normal(k_wq, (n, n), dtype=jnp.float32)
    W_K = jax.random.normal(k_wk, (n, n), dtype=jnp.float32)
    W_V = jax.random.normal(k_wv, (n, n), dtype=jnp.float32)

    # Parameter-setup-time fusion (not part of the per-call path).
    W_QKV = fuse_qkv_weights(W_Q, W_K, W_V)
    jax.block_until_ready(W_QKV)

    out, attn = encoder_decoder_attention(decoder_input, encoder_output, W_QKV)
    jax.block_until_ready((out, attn))

    ref_out, ref_attn = _reference(
        decoder_input, encoder_output, W_Q, W_K, W_V)
    assert jnp.allclose(out, ref_out, atol=1e-3, rtol=1e-3)
    assert jnp.allclose(attn, ref_attn, atol=1e-5, rtol=1e-5)

    print("KERNEL_OK")
</pallas_src>

<mosaic_0001>
module attributes {stable_mosaic.version = 11 : i64} {
  func.func @_attn_kernel(%arg0: memref<32x32xf32, #tpu.memory_space<vmem>>, %arg1: memref<32x96xf32, #tpu.memory_space<vmem>>, %arg2: memref<16x32xf32, #tpu.memory_space<vmem>>, %arg3: memref<16x8xf32, #tpu.memory_space<vmem>>) attributes {dimension_semantics = [], scalar_prefetch = 0 : i64, scratch_operands = 0 : i64, tpu.core_type = #tpu.core_type<tc>} {
    %c0 = arith.constant 0 : index
    %c0_0 = arith.constant 0 : index
    %0 = vector.load %arg0[%c0, %c0_0] : memref<32x32xf32, #tpu.memory_space<vmem>>, vector<32x32xf32>
    %c0_1 = arith.constant 0 : index
    %c0_2 = arith.constant 0 : index
    %1 = vector.load %arg1[%c0_1, %c0_2] : memref<32x96xf32, #tpu.memory_space<vmem>>, vector<32x96xf32>
    %cst = arith.constant dense<0.000000e+00> : vector<32x96xf32>
    %2 = tpu.matmul %0, %1, %cst {dimension_numbers = #tpu.dot_dimension_numbers<[1], [0], [0], [1], [0, 0, 1, 1], [], []>} : vector<32x32xf32>, vector<32x96xf32>, vector<32x96xf32> -> vector<32x96xf32>
    %3 = vector.extract_strided_slice %2 {offsets = [0, 0], sizes = [16, 32], strides = [1, 1]} : vector<32x96xf32> to vector<16x32xf32>
    %4 = vector.extract_strided_slice %2 {offsets = [16, 32], sizes = [16, 32], strides = [1, 1]} : vector<32x96xf32> to vector<16x32xf32>
    %5 = vector.extract_strided_slice %2 {offsets = [16, 64], sizes = [16, 32], strides = [1, 1]} : vector<32x96xf32> to vector<16x32xf32>
    "tpu.trace_start"() <{level = 10 : i32, message = "qd,kd->qk"}> : () -> ()
    %cst_3 = arith.constant dense<0.000000e+00> : vector<16x16xf32>
    %6 = tpu.matmul %3, %4, %cst_3 {dimension_numbers = #tpu.dot_dimension_numbers<[1], [1], [0], [0], [0, 0, 1, 0], [], []>} : vector<16x32xf32>, vector<16x32xf32>, vector<16x16xf32> -> vector<16x16xf32>
    "tpu.trace_stop"() : () -> ()
    %7 = tpu.iota {dimensions = array<i32: 0>} : vector<16x16xi32>
    %8 = tpu.iota {dimensions = array<i32: 1>} : vector<16x16xi32>
    %c3_i32 = arith.constant 3 : i32
    %9 = vector.broadcast %c3_i32 : i32 to vector<16x16xi32>
    %10 = arith.shrsi %7, %9 : vector<16x16xi32>
    %c3_i32_4 = arith.constant 3 : i32
    %11 = vector.broadcast %c3_i32_4 : i32 to vector<16x16xi32>
    %12 = arith.shrsi %8, %11 : vector<16x16xi32>
    %c7_i32 = arith.constant 7 : i32
    %13 = vector.broadcast %c7_i32 : i32 to vector<16x16xi32>
    %14 = arith.andi %7, %13 : vector<16x16xi32>
    %c7_i32_5 = arith.constant 7 : i32
    %15 = vector.broadcast %c7_i32_5 : i32 to vector<16x16xi32>
    %16 = arith.andi %8, %15 : vector<16x16xi32>
    %17 = arith.cmpi ne, %10, %12 : vector<16x16xi32>
    %18 = arith.cmpi sgt, %16, %14 : vector<16x16xi32>
    %19 = arith.ori %17, %18 : vector<16x16xi1>
    %cst_6 = arith.constant -1.000000e+30 : f32
    %20 = vector.broadcast %cst_6 : f32 to vector<16x16xf32>
    %21 = arith.select %19, %20, %6 : vector<16x16xi1>, vector<16x16xf32>
    %cst_7 = arith.constant dense<0xFF800000> : vector<16xf32>
    %22 = vector.multi_reduction <maximumf>, %21, %cst_7 [1] : vector<16x16xf32> to vector<16xf32>
    %23 = vector.shape_cast %22 : vector<16xf32> to vector<16x1xf32>
    %24 = vector.broadcast %23 : vector<16x1xf32> to vector<16x16xf32>
    %25 = arith.subf %21, %24 : vector<16x16xf32>
    %26 = math.exp %25 : vector<16x16xf32>
    %cst_8 = arith.constant dense<0.000000e+00> : vector<16xf32>
    %27 = vector.multi_reduction <add>, %26, %cst_8 [1] : vector<16x16xf32> to vector<16xf32>
    %28 = vector.shape_cast %27 : vector<16xf32> to vector<16x1xf32>
    %29 = tpu.reciprocal %28 : vector<16x1xf32> -> vector<16x1xf32>
    %30 = vector.broadcast %29 : vector<16x1xf32> to vector<16x16xf32>
    %31 = arith.mulf %26, %30 : vector<16x16xf32>
    %cst_9 = arith.constant dense<0.000000e+00> : vector<16x32xf32>
    %32 = tpu.matmul %31, %5, %cst_9 {dimension_numbers = #tpu.dot_dimension_numbers<[1], [0], [0], [1], [0, 0, 1, 1], [], []>} : vector<16x16xf32>, vector<16x32xf32>, vector<16x32xf32> -> vector<16x32xf32>
    %c0_10 = arith.constant 0 : index
    %c0_11 = arith.constant 0 : index
    %33 = vector.load %arg2[%c0_10, %c0_11] : memref<16x32xf32, #tpu.memory_space<vmem>>, vector<16x32xf32>
    tpu.vector_store %arg2[%c0_10, %c0_11], %32 {strides = array<i32>} : memref<16x32xf32, #tpu.memory_space<vmem>>, vector<16x32xf32>,
    %34 = vector.extract_strided_slice %31 {offsets = [0, 0], sizes = [8, 8], strides = [1, 1]} : vector<16x16xf32> to vector<8x8xf32>
    %35 = vector.extract_strided_slice %31 {offsets = [8, 8], sizes = [8, 8], strides = [1, 1]} : vector<16x16xf32> to vector<8x8xf32>
    %36 = tpu.concatenate %34, %35 in 0 : vector<8x8xf32>, vector<8x8xf32> -> vector<16x8xf32>
    %c0_12 = arith.constant 0 : index
    %c0_13 = arith.constant 0 : index
    %37 = vector.load %arg3[%c0_12, %c0_13] : memref<16x8xf32, #tpu.memory_space<vmem>>, vector<16x8xf32>
    tpu.vector_store %arg3[%c0_12, %c0_13], %36 {strides = array<i32>} : memref<16x8xf32, #tpu.memory_space<vmem>>, vector<16x8xf32>,
    return
  }
}

</mosaic_0001>

<bundles_post_ra>
// kernel: encoder_decoder_attention.1
= control target key start
LH: loop header
LB: loop body
LE: loop exit
PB: predicated region body
PF: predicated region fallthrough
CT: control target
= control target key end

     0   :  { %9 = vsyncpa [#allocation3], 0  ;;  %vm23_vm0 = vcmask 261120   ;;  %s617_s0 = inlined_call_operand.vmem [shape: f32[32,32], index: 0, kind: input, shape index: {}]   ;;  %s618_s1 = inlined_call_operand.vmem [shape: f32[32,96], index: 1, kind: input, shape index: {}]   ;;  %s619_s2 = inlined_call_operand.hbm [shape: f32[16,32], index: 2, kind: output, shape index: {0}]   ;;  %s620_s3 = inlined_call_operand.hbm [shape: f32[16,8], index: 3, kind: output, shape index: {1}]  }
   0x1   :  { %v19_v0 = vld [vmem:[%s618_s1] sm:$0xff]  ;;  %v20_v1 = vld [vmem:[%s618_s1 + $0x8] sm:$0xff]  ;;  %v21_v2 = vld [vmem:[%s618_s1 + $0x10] sm:$0xff] }
   0x2   :  { %v435_v3 = vpack.c.bf16 %v20_v1, %v19_v0  ;;  %v22_v4 = vld [vmem:[%s618_s1 + $0x18] sm:$0xff]  ;;  %v15_v5 = vld [vmem:[%s617_s0] sm:$0xff] }
   0x3   :  { %v439_v6 = vpack.c.bf16 %v22_v4, %v21_v2  ;;  %415 = vmatprep.mubr.msk.f32.mxu0 %vm23_vm0, %v15_v5 }
   0x4   :  { %10 = vsyncpa [#allocation5], 0  ;;  %436 = vmatprep.subr.bf16.mxu0 %v435_v3  ;;  %v16_v7 = vld [vmem:[%s617_s0 + $0x8] sm:$0xff]  ;;  %v17_v8 = vld [vmem:[%s617_s0 + $0x10] sm:$0xff]  ;;  %s526_s27 = smov 96   ;;  %v212_v19 = vlaneseq  ;;  %vm231_vm8 = vcmask 130048  }
   0x5   :  { %438 = vmatpush3.bf16.msra.mxu0 %v435_v3  ;;  %v18_v9 = vld [vmem:[%s617_s0 + $0x18] sm:$0xff]  ;;  %vm444_vm1 = vmpackc.low %vm23_vm0, %vm23_vm0  ;;  %s527_s0 = smov 64   ;;  %s528_s28 = smov 120   ;;  %vm346_vm9 = vcmask 64512  }
   0x6   :  { %440 = vmatprep.subr.bf16.mxu0 %v439_v6  ;;  %v213_v20 = vshrl.u32 %v212_v19, 7  ;;  %v216_v22 = vand.u32 127, %v212_v19  ;;  %s529_s29 = smov [#allocation4]  }
   0x7   :  { %s366_s30 = sshll.u32 %s529_s29, 4  ;;  %s367_s30 = int_to_ptr.vmem [resolvable:$true] %s366_s30 }
   0x8   :  { %v214_v21 = vadd.s32 8, %v213_v20  ;;  %v219_v24 = vshra.s32 %v216_v22, 3  ;;  %v222_v26 = vand.u32 7, %v216_v22  ;;  %v217_v27 = vshra.s32 %v213_v20, 3  ;;  %s478_s4 = scalar_lea.vmem %s367_s30, 256  ;;  %p483_p1 = scmp.lt.s32.totalorder %s367_s30, %s367_s30 }
   0x9   :  { %442 = vmatpush3.bf16.msra.mxu0 %v439_v6  ;;  %v220_v28 = vand.u32 7, %v213_v20  ;;  %p479_p0 = scmp.ne.s32.totalorder %s367_s30, %s478_s4  ;;  %p484_p2 = scmp.lt.s32.totalorder %s478_s4, %s478_s4 }
   0xa   :  { %v218_v23 = vshra.s32 %v214_v21, 3  ;;  %v221_v25 = vand.u32 7, %v214_v21  ;;  %vm223_vm4 = vcmp.ne.s32.totalorder %v217_v27, %v219_v24 }
   0xb   :  { %vm225_vm5 = vcmp.gt.s32.totalorder %v222_v26, %v220_v28  ;;  %p485_p3 = por %p484_p2, %p483_p1 }
   0xc   :  { %416 = vmatmul.mubr.msk.f32.vlgmr.msra.gmra.mrb[0].mxu0 %vm23_vm0, %v16_v7  ;;  %vm224_vm2 = vcmp.ne.s32.totalorder %v218_v23, %v219_v24  ;;  %vm226_vm3 = vcmp.gt.s32.totalorder %v222_v26, %v221_v25  ;;  %vm227_vm7 = vmor %vm223_vm4, %vm225_vm5 }
   0xd   :  { %418 = vmatprep.mubr.msk.f32.mxu0 %vm23_vm0, %v17_v8  ;;  %vm228_vm6 = vmor %vm224_vm2, %vm226_vm3  ;;  %p486_p4 = pnand %p485_p3, %p479_p0 }
  0x10   :  { %419 = vmatmul.mubr.msk.f32.gmra.mrb[2].mxu0 %vm23_vm0, %v18_v9 }
  0xdf   :  { %v417_v10 = vpop.f32.mrb[0].mxu0 }
  0xe0   :  { %v102_v11 = vpop.f32.mrb[1].mxu0 }
  0xe1   :  { %425 = vmatprep.mubr.msk.f32.mxu1 %vm23_vm0, %v102_v11 }
  0xe3   :  { %v420_v12 = vpop.f32.mrb[2].mxu0 }
  0xe4   :  { %v112_v13 = vpop.f32.mrb[3].mxu0 }
  0xe5   :  { %v465_v14 = vpack.i.bf16 %v420_v12, %v112_v13 }
  0xe7   :  { %461 = vrot.lane.b32.xlu0 %v465_v14, %s526_s27 }
 0x159   :  { %v462_v15 = vpop.permute.xlu0 %461 }
 0x15a   :  { %v464_v16 = vunpack.i.h.bf16 %v462_v15  ;;  %v463_v17 = vunpack.i.l.bf16 %v462_v15 }
 0x15c   :  { %v443_v18 = vpack.c.bf16 %v464_v16, %v463_v17 }
 0x15e   :  { %445 = vmatprep.subr.msk.bf16.mxu1 %vm444_vm1, %v443_v18 }
 0x15f   :  { %448 = vmatpush3.bf16.xpose.msk.msra.mxu1 %vm444_vm1, %v443_v18 }
 0x166   :  { %426 = vmatmul.mubr.msk.f32.vlgmr.msra.gmra.mrb[0].mxu1 %vm23_vm0, %v417_v10 }
 0x239   :  { %v427_v29 = vpop.f32.mrb[0].mxu1 }
 0x23a   :  { %v230_v30 = vsel %vm228_vm6, -1e+30, %v427_v29  ;;  %v203_v31 = vpop.f32.mrb[1].mxu1 }
 0x23b   :  { %v229_v32 = vsel %vm227_vm7, -1e+30, %v203_v31  ;;  %v235_v33 = vsel %vm231_vm8, %v230_v30, -inf }
 0x23c   :  { %236 = vmax.xlane.f32.xlu1 %v235_v33  ;;  %v232_v34 = vsel %vm231_vm8, %v229_v32, -inf }
 0x23d   :  { %233 = vmax.xlane.f32.xlu0 %v232_v34 }
 0x2c9   :  { %v237_v35 = vpop.xlane.xlu1 %236 }
 0x2ca   :  { %v239_v36 = vsub.f32 %v230_v30, %v237_v35  ;;  %v234_v37 = vpop.xlane.xlu0 %233 }
 0x2cb   :  { %v238_v38 = vsub.f32 %v229_v32, %v234_v37 }
 0x2cc   :  { %v242_v39 = vmul.f32 1.442695, %v239_v36 }
 0x2cd   :  { %v240_v40 = vmul.f32 1.442695, %v238_v38 }
 0x2ce   :  { %470 = vpow2.f32 %v242_v39 }
 0x2cf   :  { %472 = vpow2.f32 %v240_v40 }
 0x2d8   :  { %v471_v41 = vpop.eup %470 }
 0x2d9   :  { %v247_v42 = vsel %vm231_vm8, %v471_v41, 0.0  ;;  %v473_v43 = vpop.eup %472 }
 0x2da   :  { %248 = vadd.xlane.f32.xlu1 %v247_v42  ;;  %v244_v44 = vsel %vm231_vm8, %v473_v43, 0.0 }
 0x2de   :  { %245 = vadd.xlane.f32.xlu1 %v244_v44 }
 0x2ef   :  { %466 = vrot.lane.b32.xlu1 %v465_v14, %s527_s0 }
 0x367   :  { %v249_v45 = vpop.xlane.xlu1 %248 }
 0x368   :  { %474 = vrcp.f32 %v249_v45 }
 0x36b   :  { %v246_v46 = vpop.xlane.xlu1 %245 }
 0x36c   :  { %476 = vrcp.f32 %v246_v46 }
 0x36f   :  { %v467_v47 = vpop.permute.xlu1 %466 }
 0x370   :  { %v469_v48 = vunpack.i.h.bf16 %v467_v47  ;;  %v468_v49 = vunpack.i.l.bf16 %v467_v47 }
 0x372   :  { %v475_v50 = vpop.eup %474  ;;  %v449_v51 = vpack.c.bf16 %v469_v48, %v468_v49 }
 0x373   :  { %v253_v52 = vmul.f32 %v475_v50, %v471_v41 }
 0x374   :  { %450 = vmatprep.subr.bf16.mxu1 %v449_v51 }
 0x375   :  { %343 = vrot.lane.b32.xlu1 %v253_v52, %s528_s28  ;;  %452 = vmatpush3.bf16.msra.mxu1 %v449_v51 }
 0x376   :  { %v477_v53 = vpop.eup %476 }
 0x377   :  { %v252_v54 = vmul.f32 %v477_v53, %v473_v43 }
 0x379   :  { %432 = vmatprep.mubr.msk.f32.mxu1 %vm231_vm8, %v252_v54  ;;  %347 = vst.msk [vmem:[#allocation4] sm:$0xff] %vm346_vm9, %v252_v54 }
 0x37a   :  { %433 = vmatmul.mubr.msk.f32.vlgmr.msra.gmra.mrb[2].mxu1 %vm231_vm8, %v253_v52 }
 0x3e7   :  { %v344_v55 = vpop.permute.xlu1 %343 }
 0x3e8   :  { %348 = vst.msk [vmem:[#allocation4 + $0x8] sm:$0xff] %vm346_vm9, %v344_v55 }
 0x3e9   :  { %489 = shalt.err (!%p486_p4)
}
 0x3ea   :  { %s490_s7 = scalar_lea.hbm %s620_s3, 256 }
 0x3eb   :  { %p491_p5 = scmp.ne.s32.totalorder %s620_s3, %s490_s7  ;;  %p494_p6 = scmp.lt.u32.totalorder %s490_s7, %s620_s3 }
 0x3ed   :  { %p496_p7 = pnand %p494_p6, %p491_p5 }
 0x3ef   :  { %499 = shalt.err (!%p496_p7)
}
 0x3f0   :  { %s530_s12 = smov 128   ;;  %s531_s13 = smov 8  }
 0x3f1   :  { %372 = dma.vmem_to_hbm [thread:$0]  %s367_s30, 256, %s620_s3, [#allocation5], %s530_s12, %s530_s12, %s531_s13  }
 0x3f2   :  { %s532_s16 = smov [#allocation2]  }
 0x3f3   :  { %s354_s17 = sshll.u32 %s532_s16, 4  ;;  %s355_s17 = int_to_ptr.vmem [resolvable:$true] %s354_s17 }
 0x3f4   :  { %s500_s18 = scalar_lea.vmem %s355_s17, 256  ;;  %p505_p9 = scmp.lt.s32.totalorder %s355_s17, %s355_s17 }
 0x3f5   :  { %p501_p8 = scmp.ne.s32.totalorder %s355_s17, %s500_s18  ;;  %p506_p10 = scmp.lt.s32.totalorder %s500_s18, %s500_s18 }
 0x3f7   :  { %p507_p11 = por %p506_p10, %p505_p9 }
 0x3f9   :  { %p508_p12 = pnand %p507_p11, %p501_p8 }
 0x44d   :  { %v434_v56 = vpop.f32.mrb[2].mxu1 }
 0x44e   :  { %342 = vst.msk [vmem:[#allocation2 + $0x8] sm:$0xff] %vm23_vm0, %v434_v56  ;;  %v332_v57 = vpop.f32.mrb[3].mxu1 }
 0x44f   :  { %341 = vst.msk [vmem:[#allocation2] sm:$0xff] %vm23_vm0, %v332_v57 }
 0x450   :  { %511 = shalt.err (!%p508_p12)
}
 0x451   :  { %s512_s3 = scalar_lea.hbm %s619_s2, 256 }
 0x452   :  { %p513_p13 = scmp.ne.s32.totalorder %s619_s2, %s512_s3  ;;  %p516_p0 = scmp.lt.u32.totalorder %s512_s3, %s619_s2 }
 0x454   :  { %p518_p1 = pnand %p516_p0, %p513_p13 }
 0x456   :  { %521 = shalt.err (!%p518_p1)
}
 0x457   :  { %360 = dma.vmem_to_hbm [thread:$0]  %s355_s17, 256, %s619_s2, [#allocation3], %s530_s12, %s530_s12, %s531_s13  }
 0x458   :  { %522 = dma.done.wait [#allocation3], 256  }
 0x459   :  { %523 = vsyncadd [#allocation3], 4294967040 }
 0x45a   :  { %524 = dma.done.wait [#allocation5], 256  }
 0x45b   :  { %525 = vsyncadd [#allocation5], 4294967040 }
 0x45c   :  { %379 = vsyncpa [#allocation3], 1 }
 0x45d   :  { %380 = vsyncpa [#allocation5], 1 }

</bundles_post_ra>
